<compile_context>
chip_gen: v7x
topology: tpu7x:2x2x1
jax: 0.10.0
libtpu: 0.0.40
codegen_flags: <defaults>
</compile_context>

<pallas_src>
import functools

import jax
import jax.numpy as jnp
from jax.experimental import pallas as pl
from jax.experimental.pallas import tpu as pltpu

# MXU operand dtype (accumulation is always f32 via preferred_element_type).
MXU_DTYPE = jnp.bfloat16
LANE = 128        # lane-dense padded head width (out_feats=16 -> padded to 128)
BN_EPS = 1e-5


# ----------------------------------------------------------------------------- fused branch kernel
def _branch_kernel(v_ref, u_ref, deg_ref, m1_ref, m2_ref, pm_ref, pd_ref,
                   w_ref, b_ref, floor_ref, gamma_ref, beta_ref, o_ref,
                   *, src_rows, transpose_pmpd):
    """Fused GNN branch: aggregations + packed linear + ReLU-half + BatchNorm (train).

    v: features on this branch's nodes (x for the graph branch, y for the line-graph
    branch).  u: the "other" features (y, or the padded x output).
    """
    v32 = v_ref[...]
    vb = v32.astype(MXU_DTYPE)
    ub = u_ref[...].astype(MXU_DTYPE)
    dvb = (deg_ref[...] * v32).astype(MXU_DTYPE)          # deg * v (f32 mul, bf16 operand)

    # neighbourhood aggregations (0/1 adjacency powers) — MXU, f32 accumulate
    agg1 = jnp.dot(m1_ref[...], vb, preferred_element_type=jnp.float32)
    agg2 = jnp.dot(m2_ref[...], vb, preferred_element_type=jnp.float32)

    # incidence aggregations.  y-branch needs pm.T @ x / pd.T @ x: contract the *leading*
    # axis in-kernel instead of materializing a transposed copy in HBM.
    if transpose_pmpd:
        dn = (((0,), (0,)), ((), ()))
        p1 = jax.lax.dot_general(pm_ref[...], ub, dn, preferred_element_type=jnp.float32)
        p2 = jax.lax.dot_general(pd_ref[...], ub, dn, preferred_element_type=jnp.float32)
    else:
        p1 = jnp.dot(pm_ref[...], ub, preferred_element_type=jnp.float32)
        p2 = jnp.dot(pd_ref[...], ub, preferred_element_type=jnp.float32)

    # packed linear head:  pre = b + sum_k  src_k @ W_k   (partial sums, f32 accumulate)
    srcs = (vb, dvb, agg1.astype(MXU_DTYPE), agg2.astype(MXU_DTYPE),
            p1.astype(MXU_DTYPE), p2.astype(MXU_DTYPE))
    w = w_ref[...]
    pre = b_ref[...]                                       # (1, LANE) broadcasts on first add
    off = 0
    for s, rows in zip(srcs, src_rows):
        pre = pre + jnp.dot(s, w[off:off + rows, :], preferred_element_type=jnp.float32)
        off += rows

    # torch.cat([new, relu(r)], 1): ReLU only on columns >= half (and the zero padding).
    # floor = -FLT_MAX on the "new" half, 0 elsewhere -> one VPU max, no iota/select/concat.
    act = jnp.maximum(pre, floor_ref[...])

    # training-mode BatchNorm2d over the row (batch) axis — f32 epilogue
    mean = jnp.mean(act, axis=0, keepdims=True)
    var = jnp.mean((act - mean) ** 2, axis=0, keepdims=True)   # biased var (PyTorch fwd)
    o_ref[...] = (act - mean) * jax.lax.rsqrt(var + BN_EPS) * gamma_ref[...] + beta_ref[...]


def _full_spec(shape):
    return pl.BlockSpec(shape, lambda *_: (0,) * len(shape))


def fused_branch(v, u, deg, m1, m2, pm, pd, w, b, floor, gamma, beta,
                 *, src_rows, transpose_pmpd):
    n = v.shape[0]
    kern = functools.partial(_branch_kernel, src_rows=src_rows,
                             transpose_pmpd=transpose_pmpd)
    args = (v, u, deg, m1, m2, pm, pd, w, b, floor, gamma, beta)
    return pl.pallas_call(
        kern,
        out_shape=jax.ShapeDtypeStruct((n, LANE), jnp.float32),
        grid=(1,),
        in_specs=[_full_spec(a.shape) for a in args],
        out_specs=_full_spec((n, LANE)),
        compiler_params=pltpu.CompilerParams(dimension_semantics=("arbitrary",)),
    )(*args)


# ----------------------------------------------------------------------------- parameters
def init_linear(key, in_dim, out_dim):
    """PyTorch nn.Linear default init: U(-1/sqrt(in_dim), 1/sqrt(in_dim)) for W and b."""
    kw, kb = jax.random.split(key)
    bound = 1.0 / float(in_dim) ** 0.5
    w = jax.random.uniform(kw, (out_dim, in_dim), jnp.float32, -bound, bound)
    b = jax.random.uniform(kb, (out_dim,), jnp.float32, -bound, bound)
    return w, b


def make_params(key, in_feats, out_feats, radius):
    h = out_feats // 2
    params = {}
    keys = iter(jax.random.split(key, 64))
    small = [
        "theta_x", "theta_deg", "theta_y_0", "theta_y_1",
        "theta_x_r", "theta_deg_r", "theta_y_0_r", "theta_y_1_r",
        "gamma_y", "gamma_deg", "gamma_y_r", "gamma_deg_r",
    ]
    for name in small:
        params[name] = init_linear(next(keys), in_feats, h)
    for i in range(radius):
        params[f"theta_list_{i}"] = init_linear(next(keys), in_feats, h)
        params[f"theta_list_r_{i}"] = init_linear(next(keys), in_feats, h)
        params[f"gamma_list_{i}"] = init_linear(next(keys), in_feats, h)
        params[f"gamma_list_r_{i}"] = init_linear(next(keys), in_feats, h)
    for name in ["gamma_x_0", "gamma_x_1", "gamma_x_0_r", "gamma_x_1_r"]:
        params[name] = init_linear(next(keys), out_feats, h)
    # BatchNorm2d affine params (PyTorch default: weight=1, bias=0)
    params["bn_x"] = (jnp.ones((out_feats,), jnp.float32), jnp.zeros((out_feats,), jnp.float32))
    params["bn_y"] = (jnp.ones((out_feats,), jnp.float32), jnp.zeros((out_feats,), jnp.float32))
    return params


def _pad_row(v):
    return jnp.zeros((1, LANE), jnp.float32).at[0, :v.shape[0]].set(v)


def _pack_branch(params, blocks, half):
    """Pack all Linear layers feeding one branch into a single (sum_rows, LANE) weight.

    Per source block: columns [0:half) = "new" layer, [half:2*half) = `_r` layer, the
    remaining columns are zero padding (lane-dense / MXU-friendly 128-wide output).
    All biases sum into one (1, LANE) vector.
    """
    w_blocks = []
    bias = jnp.zeros((LANE,), jnp.float32)
    for name_new, name_r, rows in blocks:
        w_new, b_new = params[name_new]            # torch layout: (half, d_in), (half,)
        w_r, b_r = params[name_r]
        d_in = w_new.shape[1]
        blk = jnp.zeros((rows, LANE), jnp.float32)
        blk = blk.at[:d_in, :half].set(w_new.T)
        blk = blk.at[:d_in, half:2 * half].set(w_r.T)
        w_blocks.append(blk)
        bias = bias.at[:half].add(b_new)
        bias = bias.at[half:2 * half].add(b_r)
    return jnp.concatenate(w_blocks, axis=0), bias[None, :]


# ----------------------------------------------------------------------------- forward
def gnn_forward(params, out_feats, x, y, deg_g, deg_lg,
                mask_g_t, mask_g_tt, mask_lg_t, mask_lg_tt, pm, pd):
    h = out_feats // 2
    F = x.shape[1]

    # 0/1 structure matrices are exact in bf16 -> halve their DMA/VMEM bytes.
    m_g_t, m_g_tt = mask_g_t.astype(MXU_DTYPE), mask_g_tt.astype(MXU_DTYPE)
    m_lg_t, m_lg_tt = mask_lg_t.astype(MXU_DTYPE), mask_lg_tt.astype(MXU_DTYPE)
    pm_c, pd_c = pm.astype(MXU_DTYPE), pd.astype(MXU_DTYPE)

    # ReLU "floor": -FLT_MAX on the new half (identity), 0 on the _r half + padding.
    floor = jnp.zeros((1, LANE), jnp.float32).at[0, :h].set(jnp.finfo(jnp.float32).min)

    # ---- x (graph) branch ---------------------------------------------------
    wx, bx = _pack_branch(params, [
        ("theta_x", "theta_x_r", F), ("theta_deg", "theta_deg_r", F),
        ("theta_list_0", "theta_list_r_0", F), ("theta_list_1", "theta_list_r_1", F),
        ("theta_y_0", "theta_y_0_r", F), ("theta_y_1", "theta_y_1_r", F)], h)
    gx, btx = (_pad_row(v) for v in params["bn_x"])
    x_pad = fused_branch(x, y, deg_g, m_g_t, m_g_tt, pm_c, pd_c,
                         wx.astype(MXU_DTYPE), bx, floor, gx, btx,
                         src_rows=(F,) * 6, transpose_pmpd=False)

    # ---- y (line-graph) branch ----------------------------------------------
    # Consumes the padded x output directly (its padding columns are exact zeros and the
    # corresponding weight rows are zero), so no slice sits on the serial x->y chain.
    wy, by = _pack_branch(params, [
        ("gamma_y", "gamma_y_r", F), ("gamma_deg", "gamma_deg_r", F),
        ("gamma_list_0", "gamma_list_r_0", F), ("gamma_list_1", "gamma_list_r_1", F),
        ("gamma_x_0", "gamma_x_0_r", LANE), ("gamma_x_1", "gamma_x_1_r", LANE)], h)
    gy, bty = (_pad_row(v) for v in params["bn_y"])
    y_pad = fused_branch(y, x_pad, deg_lg, m_lg_t, m_lg_tt, pm_c, pd_c,
                         wy.astype(MXU_DTYPE), by, floor, gy, bty,
                         src_rows=(F, F, F, F, LANE, LANE), transpose_pmpd=True)

    return x_pad[:, :out_feats], y_pad[:, :out_feats]


# ----------------------------------------------------------------------------- reference (pure JAX)
# Mirrors the kernel's precision policy (bf16 MXU operands, f32 accumulation / epilogue),
# so the comparison checks the forward math exactly.  With MXU_DTYPE = float32 this is the
# strict f32 PyTorch-equivalent forward.
def _mmb(a, b):
    return jnp.dot(a.astype(MXU_DTYPE), b.astype(MXU_DTYPE),
                   preferred_element_type=jnp.float32)


def _linb(p, z):
    w, b = p
    return _mmb(z, w.T) + b


def _bn(hm, gamma, beta):
    mean = hm.mean(0, keepdims=True)
    var = ((hm - mean) ** 2).mean(0, keepdims=True)
    return (hm - mean) * jax.lax.rsqrt(var + BN_EPS) * gamma + beta


def reference_forward(p, x, y, deg_g, deg_lg,
                      mask_g_t, mask_g_tt, mask_lg_t, mask_lg_tt, pm, pd):
    pm_y, pd_y = _mmb(pm, y), _mmb(pd, y)
    x_list = [_mmb(mask_g_t, x), _mmb(mask_g_tt, x)]
    sum_x = _linb(p["theta_list_0"], x_list[0]) + _linb(p["theta_list_1"], x_list[1])
    sum_x_r = _linb(p["theta_list_r_0"], x_list[0]) + _linb(p["theta_list_r_1"], x_list[1])
    x_r = (_linb(p["theta_x_r"], x) + _linb(p["theta_deg_r"], deg_g * x) + sum_x_r
           + _linb(p["theta_y_0_r"], pm_y) + _linb(p["theta_y_1_r"], pd_y))
    x_new = (_linb(p["theta_x"], x) + _linb(p["theta_deg"], deg_g * x) + sum_x
             + _linb(p["theta_y_0"], pm_y) + _linb(p["theta_y_1"], pd_y))
    xc = _bn(jnp.concatenate([x_new, jnp.maximum(x_r, 0.0)], 1), p["bn_x"][0], p["bn_x"][1])

    y_list = [_mmb(mask_lg_t, y), _mmb(mask_lg_tt, y)]
    sum_y = _linb(p["gamma_list_0"], y_list[0]) + _linb(p["gamma_list_1"], y_list[1])
    sum_y_r = _linb(p["gamma_list_r_0"], y_list[0]) + _linb(p["gamma_list_r_1"], y_list[1])
    pm_x, pd_x = _mmb(pm.T, xc), _mmb(pd.T, xc)
    y_r = (_linb(p["gamma_y_r"], y) + _linb(p["gamma_deg_r"], deg_lg * y) + sum_y_r
           + _linb(p["gamma_x_0_r"], pm_x) + _linb(p["gamma_x_1_r"], pd_x))
    y_new = (_linb(p["gamma_y"], y) + _linb(p["gamma_deg"], deg_lg * y) + sum_y
             + _linb(p["gamma_x_0"], pm_x) + _linb(p["gamma_x_1"], pd_x))
    yc = _bn(jnp.concatenate([y_new, jnp.maximum(y_r, 0.0)], 1), p["bn_y"][0], p["bn_y"][1])
    return xc, yc


# ----------------------------------------------------------------------------- main
if __name__ == "__main__":
    in_feats, out_feats, radius = 8, 16, 2
    N, M = 16, 32  # graph nodes, line-graph nodes (directed edges)

    key = jax.random.PRNGKey(0)
    kp, kx, ky, kdg, kdl, k1, k2, k3, k4, k5, k6 = jax.random.split(key, 11)

    params = make_params(kp, in_feats, out_feats, radius)

    x = jax.random.normal(kx, (N, in_feats), jnp.float32)
    y = jax.random.normal(ky, (M, in_feats), jnp.float32)
    deg_g = jax.random.randint(kdg, (N, 1), 1, 5).astype(jnp.float32)
    deg_lg = jax.random.randint(kdl, (M, 1), 1, 5).astype(jnp.float32)
    mask_g_t = (jax.random.uniform(k1, (N, N)) < 0.3).astype(jnp.float32)
    mask_g_tt = (jax.random.uniform(k2, (N, N)) < 0.3).astype(jnp.float32)
    mask_lg_t = (jax.random.uniform(k3, (M, M)) < 0.2).astype(jnp.float32)
    mask_lg_tt = (jax.random.uniform(k4, (M, M)) < 0.2).astype(jnp.float32)
    pm = (jax.random.uniform(k5, (N, M)) < 0.15).astype(jnp.float32)
    pd = (jax.random.uniform(k6, (N, M)) < 0.15).astype(jnp.float32)

    fwd = jax.jit(gnn_forward, static_argnums=(1,))
    x_out, y_out = fwd(params, out_feats, x, y, deg_g, deg_lg,
                       mask_g_t, mask_g_tt, mask_lg_t, mask_lg_tt, pm, pd)
    jax.block_until_ready((x_out, y_out))

    # correctness check against a pure-JAX reference (same precision policy as the kernel)
    x_ref, y_ref = reference_forward(params, x, y, deg_g, deg_lg,
                                     mask_g_t, mask_g_tt, mask_lg_t, mask_lg_tt, pm, pd)
    assert x_out.shape == (N, out_feats) and y_out.shape == (M, out_feats)
    assert jnp.allclose(x_out, x_ref, atol=5e-3, rtol=5e-3)
    assert jnp.allclose(y_out, y_ref, atol=5e-3, rtol=5e-3)

    print("KERNEL_OK")
</pallas_src>

<mosaic_0001>
module attributes {stable_mosaic.version = 11 : i64} {
  func.func @_branch_kernel(%arg0: i32, %arg1: memref<16x8xf32, #tpu.memory_space<vmem>>, %arg2: memref<32x8xf32, #tpu.memory_space<vmem>>, %arg3: memref<16x1xf32, #tpu.memory_space<vmem>>, %arg4: memref<16x16xbf16, #tpu.memory_space<vmem>>, %arg5: memref<16x16xbf16, #tpu.memory_space<vmem>>, %arg6: memref<16x32xbf16, #tpu.memory_space<vmem>>, %arg7: memref<16x32xbf16, #tpu.memory_space<vmem>>, %arg8: memref<48x128xbf16, #tpu.memory_space<vmem>>, %arg9: memref<1x128xf32, #tpu.memory_space<vmem>>, %arg10: memref<1x128xf32, #tpu.memory_space<vmem>>, %arg11: memref<1x128xf32, #tpu.memory_space<vmem>>, %arg12: memref<1x128xf32, #tpu.memory_space<vmem>>, %arg13: memref<16x128xf32, #tpu.memory_space<vmem>>) attributes {dimension_semantics = [#tpu.dimension_semantics<arbitrary>], iteration_bounds = array<i64: 1>, scalar_prefetch = 0 : i64, scratch_operands = 0 : i64, tpu.core_type = #tpu.core_type<tc>, window_params = [{pipeline_mode = #tpu.pipeline_mode<synchronous>, transform_indices = @transform_0, window_bounds = array<i64: 16, 8>}, {pipeline_mode = #tpu.pipeline_mode<synchronous>, transform_indices = @transform_1, window_bounds = array<i64: 32, 8>}, {pipeline_mode = #tpu.pipeline_mode<synchronous>, transform_indices = @transform_2, window_bounds = array<i64: 16, 1>}, {pipeline_mode = #tpu.pipeline_mode<synchronous>, transform_indices = @transform_3, window_bounds = array<i64: 16, 16>}, {pipeline_mode = #tpu.pipeline_mode<synchronous>, transform_indices = @transform_4, window_bounds = array<i64: 16, 16>}, {pipeline_mode = #tpu.pipeline_mode<synchronous>, transform_indices = @transform_5, window_bounds = array<i64: 16, 32>}, {pipeline_mode = #tpu.pipeline_mode<synchronous>, transform_indices = @transform_6, window_bounds = array<i64: 16, 32>}, {pipeline_mode = #tpu.pipeline_mode<synchronous>, transform_indices = @transform_7, window_bounds = array<i64: 48, 128>}, {pipeline_mode = #tpu.pipeline_mode<synchronous>, transform_indices = @transform_8, window_bounds = array<i64: 1, 128>}, {pipeline_mode = #tpu.pipeline_mode<synchronous>, transform_indices = @transform_9, window_bounds = array<i64: 1, 128>}, {pipeline_mode = #tpu.pipeline_mode<synchronous>, transform_indices = @transform_10, window_bounds = array<i64: 1, 128>}, {pipeline_mode = #tpu.pipeline_mode<synchronous>, transform_indices = @transform_11, window_bounds = array<i64: 1, 128>}, {pipeline_mode = #tpu.pipeline_mode<synchronous>, transform_indices = @transform_12, window_bounds = array<i64: 16, 128>}]} {
    %c0 = arith.constant 0 : index
    %c0_0 = arith.constant 0 : index
    %0 = vector.load %arg1[%c0, %c0_0] : memref<16x8xf32, #tpu.memory_space<vmem>>, vector<16x8xf32>
    %1 = arith.truncf %0 : vector<16x8xf32> to vector<16x8xbf16>
    %c0_1 = arith.constant 0 : index
    %c0_2 = arith.constant 0 : index
    %2 = vector.load %arg2[%c0_1, %c0_2] : memref<32x8xf32, #tpu.memory_space<vmem>>, vector<32x8xf32>
    %3 = arith.truncf %2 : vector<32x8xf32> to vector<32x8xbf16>
    %c0_3 = arith.constant 0 : index
    %c0_4 = arith.constant 0 : index
    %4 = vector.load %arg3[%c0_3, %c0_4] : memref<16x1xf32, #tpu.memory_space<vmem>>, vector<16x1xf32>
    %5 = vector.broadcast %4 : vector<16x1xf32> to vector<16x8xf32>
    %6 = arith.mulf %5, %0 : vector<16x8xf32>
    %7 = arith.truncf %6 : vector<16x8xf32> to vector<16x8xbf16>
    %c0_5 = arith.constant 0 : index
    %c0_6 = arith.constant 0 : index
    %8 = vector.load %arg4[%c0_5, %c0_6] : memref<16x16xbf16, #tpu.memory_space<vmem>>, vector<16x16xbf16>
    %cst = arith.constant dense<0.000000e+00> : vector<16x8xf32>
    %9 = tpu.matmul %8, %1, %cst {dimension_numbers = #tpu.dot_dimension_numbers<[1], [0], [0], [1], [0, 0, 1, 1], [], []>} : vector<16x16xbf16>, vector<16x8xbf16>, vector<16x8xf32> -> vector<16x8xf32>
    %c0_7 = arith.constant 0 : index
    %c0_8 = arith.constant 0 : index
    %10 = vector.load %arg5[%c0_7, %c0_8] : memref<16x16xbf16, #tpu.memory_space<vmem>>, vector<16x16xbf16>
    %cst_9 = arith.constant dense<0.000000e+00> : vector<16x8xf32>
    %11 = tpu.matmul %10, %1, %cst_9 {dimension_numbers = #tpu.dot_dimension_numbers<[1], [0], [0], [1], [0, 0, 1, 1], [], []>} : vector<16x16xbf16>, vector<16x8xbf16>, vector<16x8xf32> -> vector<16x8xf32>
    %c0_10 = arith.constant 0 : index
    %c0_11 = arith.constant 0 : index
    %12 = vector.load %arg6[%c0_10, %c0_11] : memref<16x32xbf16, #tpu.memory_space<vmem>>, vector<16x32xbf16>
    %cst_12 = arith.constant dense<0.000000e+00> : vector<16x8xf32>
    %13 = tpu.matmul %12, %3, %cst_12 {dimension_numbers = #tpu.dot_dimension_numbers<[1], [0], [0], [1], [0, 0, 1, 1], [], []>} : vector<16x32xbf16>, vector<32x8xbf16>, vector<16x8xf32> -> vector<16x8xf32>
    %c0_13 = arith.constant 0 : index
    %c0_14 = arith.constant 0 : index
    %14 = vector.load %arg7[%c0_13, %c0_14] : memref<16x32xbf16, #tpu.memory_space<vmem>>, vector<16x32xbf16>
    %cst_15 = arith.constant dense<0.000000e+00> : vector<16x8xf32>
    %15 = tpu.matmul %14, %3, %cst_15 {dimension_numbers = #tpu.dot_dimension_numbers<[1], [0], [0], [1], [0, 0, 1, 1], [], []>} : vector<16x32xbf16>, vector<32x8xbf16>, vector<16x8xf32> -> vector<16x8xf32>
    %16 = arith.truncf %9 : vector<16x8xf32> to vector<16x8xbf16>
    %17 = arith.truncf %11 : vector<16x8xf32> to vector<16x8xbf16>
    %18 = arith.truncf %13 : vector<16x8xf32> to vector<16x8xbf16>
    %19 = arith.truncf %15 : vector<16x8xf32> to vector<16x8xbf16>
    %c0_16 = arith.constant 0 : index
    %c0_17 = arith.constant 0 : index
    %20 = vector.load %arg8[%c0_16, %c0_17] : memref<48x128xbf16, #tpu.memory_space<vmem>>, vector<48x128xbf16>
    %c0_18 = arith.constant 0 : index
    %c0_19 = arith.constant 0 : index
    %21 = vector.load %arg9[%c0_18, %c0_19] : memref<1x128xf32, #tpu.memory_space<vmem>>, vector<1x128xf32>
    %22 = vector.extract_strided_slice %20 {offsets = [0, 0], sizes = [8, 128], strides = [1, 1]} : vector<48x128xbf16> to vector<8x128xbf16>
    %cst_20 = arith.constant dense<0.000000e+00> : vector<16x128xf32>
    %23 = tpu.matmul %1, %22, %cst_20 {dimension_numbers = #tpu.dot_dimension_numbers<[1], [0], [0], [1], [0, 0, 1, 1], [], []>} : vector<16x8xbf16>, vector<8x128xbf16>, vector<16x128xf32> -> vector<16x128xf32>
    %24 = vector.broadcast %21 : vector<1x128xf32> to vector<16x128xf32>
    %25 = arith.addf %24, %23 : vector<16x128xf32>
    %26 = vector.extract_strided_slice %20 {offsets = [8, 0], sizes = [8, 128], strides = [1, 1]} : vector<48x128xbf16> to vector<8x128xbf16>
    %cst_21 = arith.constant dense<0.000000e+00> : vector<16x128xf32>
    %27 = tpu.matmul %7, %26, %cst_21 {dimension_numbers = #tpu.dot_dimension_numbers<[1], [0], [0], [1], [0, 0, 1, 1], [], []>} : vector<16x8xbf16>, vector<8x128xbf16>, vector<16x128xf32> -> vector<16x128xf32>
    %28 = arith.addf %25, %27 : vector<16x128xf32>
    %29 = vector.extract_strided_slice %20 {offsets = [16, 0], sizes = [8, 128], strides = [1, 1]} : vector<48x128xbf16> to vector<8x128xbf16>
    %cst_22 = arith.constant dense<0.000000e+00> : vector<16x128xf32>
    %30 = tpu.matmul %16, %29, %cst_22 {dimension_numbers = #tpu.dot_dimension_numbers<[1], [0], [0], [1], [0, 0, 1, 1], [], []>} : vector<16x8xbf16>, vector<8x128xbf16>, vector<16x128xf32> -> vector<16x128xf32>
    %31 = arith.addf %28, %30 : vector<16x128xf32>
    %32 = vector.extract_strided_slice %20 {offsets = [24, 0], sizes = [8, 128], strides = [1, 1]} : vector<48x128xbf16> to vector<8x128xbf16>
    %cst_23 = arith.constant dense<0.000000e+00> : vector<16x128xf32>
    %33 = tpu.matmul %17, %32, %cst_23 {dimension_numbers = #tpu.dot_dimension_numbers<[1], [0], [0], [1], [0, 0, 1, 1], [], []>} : vector<16x8xbf16>, vector<8x128xbf16>, vector<16x128xf32> -> vector<16x128xf32>
    %34 = arith.addf %31, %33 : vector<16x128xf32>
    %35 = vector.extract_strided_slice %20 {offsets = [32, 0], sizes = [8, 128], strides = [1, 1]} : vector<48x128xbf16> to vector<8x128xbf16>
    %cst_24 = arith.constant dense<0.000000e+00> : vector<16x128xf32>
    %36 = tpu.matmul %18, %35, %cst_24 {dimension_numbers = #tpu.dot_dimension_numbers<[1], [0], [0], [1], [0, 0, 1, 1], [], []>} : vector<16x8xbf16>, vector<8x128xbf16>, vector<16x128xf32> -> vector<16x128xf32>
    %37 = arith.addf %34, %36 : vector<16x128xf32>
    %38 = vector.extract_strided_slice %20 {offsets = [40, 0], sizes = [8, 128], strides = [1, 1]} : vector<48x128xbf16> to vector<8x128xbf16>
    %cst_25 = arith.constant dense<0.000000e+00> : vector<16x128xf32>
    %39 = tpu.matmul %19, %38, %cst_25 {dimension_numbers = #tpu.dot_dimension_numbers<[1], [0], [0], [1], [0, 0, 1, 1], [], []>} : vector<16x8xbf16>, vector<8x128xbf16>, vector<16x128xf32> -> vector<16x128xf32>
    %40 = arith.addf %37, %39 : vector<16x128xf32>
    %c0_26 = arith.constant 0 : index
    %c0_27 = arith.constant 0 : index
    %41 = vector.load %arg10[%c0_26, %c0_27] : memref<1x128xf32, #tpu.memory_space<vmem>>, vector<1x128xf32>
    %42 = vector.broadcast %41 : vector<1x128xf32> to vector<16x128xf32>
    %43 = arith.maximumf %40, %42 : vector<16x128xf32>
    %cst_28 = arith.constant dense<0.000000e+00> : vector<128xf32>
    %44 = vector.multi_reduction <add>, %43, %cst_28 [0] : vector<16x128xf32> to vector<128xf32>
    %45 = vector.shape_cast %44 : vector<128xf32> to vector<1x128xf32>
    %cst_29 = arith.constant 1.600000e+01 : f32
    %46 = vector.broadcast %cst_29 : f32 to vector<1x128xf32>
    %47 = arith.divf %45, %46 : vector<1x128xf32>
    %48 = vector.broadcast %47 : vector<1x128xf32> to vector<16x128xf32>
    %49 = arith.subf %43, %48 : vector<16x128xf32>
    %50 = arith.mulf %49, %49 : vector<16x128xf32>
    %cst_30 = arith.constant dense<0.000000e+00> : vector<128xf32>
    %51 = vector.multi_reduction <add>, %50, %cst_30 [0] : vector<16x128xf32> to vector<128xf32>
    %52 = vector.shape_cast %51 : vector<128xf32> to vector<1x128xf32>
    %cst_31 = arith.constant 1.600000e+01 : f32
    %53 = vector.broadcast %cst_31 : f32 to vector<1x128xf32>
    %54 = arith.divf %52, %53 : vector<1x128xf32>
    %55 = vector.broadcast %47 : vector<1x128xf32> to vector<16x128xf32>
    %56 = arith.subf %43, %55 : vector<16x128xf32>
    %cst_32 = arith.constant 9.99999974E-6 : f32
    %57 = vector.broadcast %cst_32 : f32 to vector<1x128xf32>
    %58 = arith.addf %54, %57 : vector<1x128xf32>
    %59 = math.rsqrt %58 : vector<1x128xf32>
    %60 = vector.broadcast %59 : vector<1x128xf32> to vector<16x128xf32>
    %61 = arith.mulf %56, %60 : vector<16x128xf32>
    %c0_33 = arith.constant 0 : index
    %c0_34 = arith.constant 0 : index
    %62 = vector.load %arg11[%c0_33, %c0_34] : memref<1x128xf32, #tpu.memory_space<vmem>>, vector<1x128xf32>
    %63 = vector.broadcast %62 : vector<1x128xf32> to vector<16x128xf32>
    %64 = arith.mulf %61, %63 : vector<16x128xf32>
    %c0_35 = arith.constant 0 : index
    %c0_36 = arith.constant 0 : index
    %65 = vector.load %arg12[%c0_35, %c0_36] : memref<1x128xf32, #tpu.memory_space<vmem>>, vector<1x128xf32>
    %66 = vector.broadcast %65 : vector<1x128xf32> to vector<16x128xf32>
    %67 = arith.addf %64, %66 : vector<16x128xf32>
    %c0_37 = arith.constant 0 : index
    %c0_38 = arith.constant 0 : index
    %68 = vector.load %arg13[%c0_37, %c0_38] : memref<16x128xf32, #tpu.memory_space<vmem>>, vector<16x128xf32>
    tpu.vector_store %arg13[%c0_37, %c0_38], %67 {strides = array<i32>} : memref<16x128xf32, #tpu.memory_space<vmem>>, vector<16x128xf32>,
    return
  }
  func.func @transform_0(%arg0: i32) -> (i32, i32) {
    %c0_i32 = arith.constant 0 : i32
    %c0_i32_0 = arith.constant 0 : i32
    %c0_i32_1 = arith.constant 0 : i32
    return %c0_i32, %c0_i32_0 : i32, i32
  }
  func.func @transform_1(%arg0: i32) -> (i32, i32) {
    %c0_i32 = arith.constant 0 : i32
    %c0_i32_0 = arith.constant 0 : i32
    %c0_i32_1 = arith.constant 0 : i32
    return %c0_i32, %c0_i32_0 : i32, i32
  }
  func.func @transform_2(%arg0: i32) -> (i32, i32) {
    %c0_i32 = arith.constant 0 : i32
    %c0_i32_0 = arith.constant 0 : i32
    %c0_i32_1 = arith.constant 0 : i32
    return %c0_i32, %c0_i32_0 : i32, i32
  }
  func.func @transform_3(%arg0: i32) -> (i32, i32) {
    %c0_i32 = arith.constant 0 : i32
    %c0_i32_0 = arith.constant 0 : i32
    %c0_i32_1 = arith.constant 0 : i32
    return %c0_i32, %c0_i32_0 : i32, i32
  }
  func.func @transform_4(%arg0: i32) -> (i32, i32) {
    %c0_i32 = arith.constant 0 : i32
    %c0_i32_0 = arith.constant 0 : i32
    %c0_i32_1 = arith.constant 0 : i32
    return %c0_i32, %c0_i32_0 : i32, i32
  }
  func.func @transform_5(%arg0: i32) -> (i32, i32) {
    %c0_i32 = arith.constant 0 : i32
    %c0_i32_0 = arith.constant 0 : i32
    %c0_i32_1 = arith.constant 0 : i32
    return %c0_i32, %c0_i32_0 : i32, i32
  }
  func.func @transform_6(%arg0: i32) -> (i32, i32) {
    %c0_i32 = arith.constant 0 : i32
    %c0_i32_0 = arith.constant 0 : i32
    %c0_i32_1 = arith.constant 0 : i32
    return %c0_i32, %c0_i32_0 : i32, i32
  }
  func.func @transform_7(%arg0: i32) -> (i32, i32) {
    %c0_i32 = arith.constant 0 : i32
    %c0_i32_0 = arith.constant 0 : i32
    %c0_i32_1 = arith.constant 0 : i32
    return %c0_i32, %c0_i32_0 : i32, i32
  }
  func.func @transform_8(%arg0: i32) -> (i32, i32) {
    %c0_i32 = arith.constant 0 : i32
    %c0_i32_0 = arith.constant 0 : i32
    %c0_i32_1 = arith.constant 0 : i32
    return %c0_i32, %c0_i32_0 : i32, i32
  }
  func.func @transform_9(%arg0: i32) -> (i32, i32) {
    %c0_i32 = arith.constant 0 : i32
    %c0_i32_0 = arith.constant 0 : i32
    %c0_i32_1 = arith.constant 0 : i32
    return %c0_i32, %c0_i32_0 : i32, i32
  }
  func.func @transform_10(%arg0: i32) -> (i32, i32) {
    %c0_i32 = arith.constant 0 : i32
    %c0_i32_0 = arith.constant 0 : i32
    %c0_i32_1 = arith.constant 0 : i32
    return %c0_i32, %c0_i32_0 : i32, i32
  }
  func.func @transform_11(%arg0: i32) -> (i32, i32) {
    %c0_i32 = arith.constant 0 : i32
    %c0_i32_0 = arith.constant 0 : i32
    %c0_i32_1 = arith.constant 0 : i32
    return %c0_i32, %c0_i32_0 : i32, i32
  }
  func.func @transform_12(%arg0: i32) -> (i32, i32) {
    %c0_i32 = arith.constant 0 : i32
    %c0_i32_0 = arith.constant 0 : i32
    %c0_i32_1 = arith.constant 0 : i32
    return %c0_i32, %c0_i32_0 : i32, i32
  }
}

module attributes {stable_mosaic.version = 11 : i64} {
  func.func @_branch_kernel(%arg0: i32, %arg1: memref<32x8xf32, #tpu.memory_space<vmem>>, %arg2: memref<16x128xf32, #tpu.memory_space<vmem>>, %arg3: memref<32x1xf32, #tpu.memory_space<vmem>>, %arg4: memref<32x32xbf16, #tpu.memory_space<vmem>>, %arg5: memref<32x32xbf16, #tpu.memory_space<vmem>>, %arg6: memref<16x32xbf16, #tpu.memory_space<vmem>>, %arg7: memref<16x32xbf16, #tpu.memory_space<vmem>>, %arg8: memref<288x128xbf16, #tpu.memory_space<vmem>>, %arg9: memref<1x128xf32, #tpu.memory_space<vmem>>, %arg10: memref<1x128xf32, #tpu.memory_space<vmem>>, %arg11: memref<1x128xf32, #tpu.memory_space<vmem>>, %arg12: memref<1x128xf32, #tpu.memory_space<vmem>>, %arg13: memref<32x128xf32, #tpu.memory_space<vmem>>) attributes {dimension_semantics = [#tpu.dimension_semantics<arbitrary>], iteration_bounds = array<i64: 1>, scalar_prefetch = 0 : i64, scratch_operands = 0 : i64, tpu.core_type = #tpu.core_type<tc>, window_params = [{pipeline_mode = #tpu.pipeline_mode<synchronous>, transform_indices = @transform_0, window_bounds = array<i64: 32, 8>}, {pipeline_mode = #tpu.pipeline_mode<synchronous>, transform_indices = @transform_1, window_bounds = array<i64: 16, 128>}, {pipeline_mode = #tpu.pipeline_mode<synchronous>, transform_indices = @transform_2, window_bounds = array<i64: 32, 1>}, {pipeline_mode = #tpu.pipeline_mode<synchronous>, transform_indices = @transform_3, window_bounds = array<i64: 32, 32>}, {pipeline_mode = #tpu.pipeline_mode<synchronous>, transform_indices = @transform_4, window_bounds = array<i64: 32, 32>}, {pipeline_mode = #tpu.pipeline_mode<synchronous>, transform_indices = @transform_5, window_bounds = array<i64: 16, 32>}, {pipeline_mode = #tpu.pipeline_mode<synchronous>, transform_indices = @transform_6, window_bounds = array<i64: 16, 32>}, {pipeline_mode = #tpu.pipeline_mode<synchronous>, transform_indices = @transform_7, window_bounds = array<i64: 288, 128>}, {pipeline_mode = #tpu.pipeline_mode<synchronous>, transform_indices = @transform_8, window_bounds = array<i64: 1, 128>}, {pipeline_mode = #tpu.pipeline_mode<synchronous>, transform_indices = @transform_9, window_bounds = array<i64: 1, 128>}, {pipeline_mode = #tpu.pipeline_mode<synchronous>, transform_indices = @transform_10, window_bounds = array<i64: 1, 128>}, {pipeline_mode = #tpu.pipeline_mode<synchronous>, transform_indices = @transform_11, window_bounds = array<i64: 1, 128>}, {pipeline_mode = #tpu.pipeline_mode<synchronous>, transform_indices = @transform_12, window_bounds = array<i64: 32, 128>}]} {
    %c0 = arith.constant 0 : index
    %c0_0 = arith.constant 0 : index
    %0 = vector.load %arg1[%c0, %c0_0] : memref<32x8xf32, #tpu.memory_space<vmem>>, vector<32x8xf32>
    %1 = arith.truncf %0 : vector<32x8xf32> to vector<32x8xbf16>
    %c0_1 = arith.constant 0 : index
    %c0_2 = arith.constant 0 : index
    %2 = vector.load %arg2[%c0_1, %c0_2] : memref<16x128xf32, #tpu.memory_space<vmem>>, vector<16x128xf32>
    %3 = arith.truncf %2 : vector<16x128xf32> to vector<16x128xbf16>
    %c0_3 = arith.constant 0 : index
    %c0_4 = arith.constant 0 : index
    %4 = vector.load %arg3[%c0_3, %c0_4] : memref<32x1xf32, #tpu.memory_space<vmem>>, vector<32x1xf32>
    %5 = vector.broadcast %4 : vector<32x1xf32> to vector<32x8xf32>
    %6 = arith.mulf %5, %0 : vector<32x8xf32>
    %7 = arith.truncf %6 : vector<32x8xf32> to vector<32x8xbf16>
    %c0_5 = arith.constant 0 : index
    %c0_6 = arith.constant 0 : index
    %8 = vector.load %arg4[%c0_5, %c0_6] : memref<32x32xbf16, #tpu.memory_space<vmem>>, vector<32x32xbf16>
    %cst = arith.constant dense<0.000000e+00> : vector<32x8xf32>
    %9 = tpu.matmul %8, %1, %cst {dimension_numbers = #tpu.dot_dimension_numbers<[1], [0], [0], [1], [0, 0, 1, 1], [], []>} : vector<32x32xbf16>, vector<32x8xbf16>, vector<32x8xf32> -> vector<32x8xf32>
    %c0_7 = arith.constant 0 : index
    %c0_8 = arith.constant 0 : index
    %10 = vector.load %arg5[%c0_7, %c0_8] : memref<32x32xbf16, #tpu.memory_space<vmem>>, vector<32x32xbf16>
    %cst_9 = arith.constant dense<0.000000e+00> : vector<32x8xf32>
    %11 = tpu.matmul %10, %1, %cst_9 {dimension_numbers = #tpu.dot_dimension_numbers<[1], [0], [0], [1], [0, 0, 1, 1], [], []>} : vector<32x32xbf16>, vector<32x8xbf16>, vector<32x8xf32> -> vector<32x8xf32>
    %c0_10 = arith.constant 0 : index
    %c0_11 = arith.constant 0 : index
    %12 = vector.load %arg6[%c0_10, %c0_11] : memref<16x32xbf16, #tpu.memory_space<vmem>>, vector<16x32xbf16>
    %cst_12 = arith.constant dense<0.000000e+00> : vector<32x128xf32>
    %13 = tpu.matmul %12, %3, %cst_12 {dimension_numbers = #tpu.dot_dimension_numbers<[0], [0], [1], [1], [0, 1, 1, 1], [], []>} : vector<16x32xbf16>, vector<16x128xbf16>, vector<32x128xf32> -> vector<32x128xf32>
    %c0_13 = arith.constant 0 : index
    %c0_14 = arith.constant 0 : index
    %14 = vector.load %arg7[%c0_13, %c0_14] : memref<16x32xbf16, #tpu.memory_space<vmem>>, vector<16x32xbf16>
    %cst_15 = arith.constant dense<0.000000e+00> : vector<32x128xf32>
    %15 = tpu.matmul %14, %3, %cst_15 {dimension_numbers = #tpu.dot_dimension_numbers<[0], [0], [1], [1], [0, 1, 1, 1], [], []>} : vector<16x32xbf16>, vector<16x128xbf16>, vector<32x128xf32> -> vector<32x128xf32>
    %16 = arith.truncf %9 : vector<32x8xf32> to vector<32x8xbf16>
    %17 = arith.truncf %11 : vector<32x8xf32> to vector<32x8xbf16>
    %18 = arith.truncf %13 : vector<32x128xf32> to vector<32x128xbf16>
    %19 = arith.truncf %15 : vector<32x128xf32> to vector<32x128xbf16>
    %c0_16 = arith.constant 0 : index
    %c0_17 = arith.constant 0 : index
    %20 = vector.load %arg8[%c0_16, %c0_17] : memref<288x128xbf16, #tpu.memory_space<vmem>>, vector<288x128xbf16>
    %c0_18 = arith.constant 0 : index
    %c0_19 = arith.constant 0 : index
    %21 = vector.load %arg9[%c0_18, %c0_19] : memref<1x128xf32, #tpu.memory_space<vmem>>, vector<1x128xf32>
    %22 = vector.extract_strided_slice %20 {offsets = [0, 0], sizes = [8, 128], strides = [1, 1]} : vector<288x128xbf16> to vector<8x128xbf16>
    %cst_20 = arith.constant dense<0.000000e+00> : vector<32x128xf32>
    %23 = tpu.matmul %1, %22, %cst_20 {dimension_numbers = #tpu.dot_dimension_numbers<[1], [0], [0], [1], [0, 0, 1, 1], [], []>} : vector<32x8xbf16>, vector<8x128xbf16>, vector<32x128xf32> -> vector<32x128xf32>
    %24 = vector.broadcast %21 : vector<1x128xf32> to vector<32x128xf32>
    %25 = arith.addf %24, %23 : vector<32x128xf32>
    %26 = vector.extract_strided_slice %20 {offsets = [8, 0], sizes = [8, 128], strides = [1, 1]} : vector<288x128xbf16> to vector<8x128xbf16>
    %cst_21 = arith.constant dense<0.000000e+00> : vector<32x128xf32>
    %27 = tpu.matmul %7, %26, %cst_21 {dimension_numbers = #tpu.dot_dimension_numbers<[1], [0], [0], [1], [0, 0, 1, 1], [], []>} : vector<32x8xbf16>, vector<8x128xbf16>, vector<32x128xf32> -> vector<32x128xf32>
    %28 = arith.addf %25, %27 : vector<32x128xf32>
    %29 = vector.extract_strided_slice %20 {offsets = [16, 0], sizes = [8, 128], strides = [1, 1]} : vector<288x128xbf16> to vector<8x128xbf16>
    %cst_22 = arith.constant dense<0.000000e+00> : vector<32x128xf32>
    %30 = tpu.matmul %16, %29, %cst_22 {dimension_numbers = #tpu.dot_dimension_numbers<[1], [0], [0], [1], [0, 0, 1, 1], [], []>} : vector<32x8xbf16>, vector<8x128xbf16>, vector<32x128xf32> -> vector<32x128xf32>
    %31 = arith.addf %28, %30 : vector<32x128xf32>
    %32 = vector.extract_strided_slice %20 {offsets = [24, 0], sizes = [8, 128], strides = [1, 1]} : vector<288x128xbf16> to vector<8x128xbf16>
    %cst_23 = arith.constant dense<0.000000e+00> : vector<32x128xf32>
    %33 = tpu.matmul %17, %32, %cst_23 {dimension_numbers = #tpu.dot_dimension_numbers<[1], [0], [0], [1], [0, 0, 1, 1], [], []>} : vector<32x8xbf16>, vector<8x128xbf16>, vector<32x128xf32> -> vector<32x128xf32>
    %34 = arith.addf %31, %33 : vector<32x128xf32>
    %35 = vector.extract_strided_slice %20 {offsets = [32, 0], sizes = [128, 128], strides = [1, 1]} : vector<288x128xbf16> to vector<128x128xbf16>
    %cst_24 = arith.constant dense<0.000000e+00> : vector<32x128xf32>
    %36 = tpu.matmul %18, %35, %cst_24 {dimension_numbers = #tpu.dot_dimension_numbers<[1], [0], [0], [1], [0, 0, 1, 1], [], []>} : vector<32x128xbf16>, vector<128x128xbf16>, vector<32x128xf32> -> vector<32x128xf32>
    %37 = arith.addf %34, %36 : vector<32x128xf32>
    %38 = vector.extract_strided_slice %20 {offsets = [160, 0], sizes = [128, 128], strides = [1, 1]} : vector<288x128xbf16> to vector<128x128xbf16>
    %cst_25 = arith.constant dense<0.000000e+00> : vector<32x128xf32>
    %39 = tpu.matmul %19, %38, %cst_25 {dimension_numbers = #tpu.dot_dimension_numbers<[1], [0], [0], [1], [0, 0, 1, 1], [], []>} : vector<32x128xbf16>, vector<128x128xbf16>, vector<32x128xf32> -> vector<32x128xf32>
    %40 = arith.addf %37, %39 : vector<32x128xf32>
    %c0_26 = arith.constant 0 : index
    %c0_27 = arith.constant 0 : index
    %41 = vector.load %arg10[%c0_26, %c0_27] : memref<1x128xf32, #tpu.memory_space<vmem>>, vector<1x128xf32>
    %42 = vector.broadcast %41 : vector<1x128xf32> to vector<32x128xf32>
    %43 = arith.maximumf %40, %42 : vector<32x128xf32>
    %cst_28 = arith.constant dense<0.000000e+00> : vector<128xf32>
    %44 = vector.multi_reduction <add>, %43, %cst_28 [0] : vector<32x128xf32> to vector<128xf32>
    %45 = vector.shape_cast %44 : vector<128xf32> to vector<1x128xf32>
    %cst_29 = arith.constant 3.200000e+01 : f32
    %46 = vector.broadcast %cst_29 : f32 to vector<1x128xf32>
    %47 = arith.divf %45, %46 : vector<1x128xf32>
    %48 = vector.broadcast %47 : vector<1x128xf32> to vector<32x128xf32>
    %49 = arith.subf %43, %48 : vector<32x128xf32>
    %50 = arith.mulf %49, %49 : vector<32x128xf32>
    %cst_30 = arith.constant dense<0.000000e+00> : vector<128xf32>
    %51 = vector.multi_reduction <add>, %50, %cst_30 [0] : vector<32x128xf32> to vector<128xf32>
    %52 = vector.shape_cast %51 : vector<128xf32> to vector<1x128xf32>
    %cst_31 = arith.constant 3.200000e+01 : f32
    %53 = vector.broadcast %cst_31 : f32 to vector<1x128xf32>
    %54 = arith.divf %52, %53 : vector<1x128xf32>
    %55 = vector.broadcast %47 : vector<1x128xf32> to vector<32x128xf32>
    %56 = arith.subf %43, %55 : vector<32x128xf32>
    %cst_32 = arith.constant 9.99999974E-6 : f32
    %57 = vector.broadcast %cst_32 : f32 to vector<1x128xf32>
    %58 = arith.addf %54, %57 : vector<1x128xf32>
    %59 = math.rsqrt %58 : vector<1x128xf32>
    %60 = vector.broadcast %59 : vector<1x128xf32> to vector<32x128xf32>
    %61 = arith.mulf %56, %60 : vector<32x128xf32>
    %c0_33 = arith.constant 0 : index
    %c0_34 = arith.constant 0 : index
    %62 = vector.load %arg11[%c0_33, %c0_34] : memref<1x128xf32, #tpu.memory_space<vmem>>, vector<1x128xf32>
    %63 = vector.broadcast %62 : vector<1x128xf32> to vector<32x128xf32>
    %64 = arith.mulf %61, %63 : vector<32x128xf32>
    %c0_35 = arith.constant 0 : index
    %c0_36 = arith.constant 0 : index
    %65 = vector.load %arg12[%c0_35, %c0_36] : memref<1x128xf32, #tpu.memory_space<vmem>>, vector<1x128xf32>
    %66 = vector.broadcast %65 : vector<1x128xf32> to vector<32x128xf32>
    %67 = arith.addf %64, %66 : vector<32x128xf32>
    %c0_37 = arith.constant 0 : index
    %c0_38 = arith.constant 0 : index
    %68 = vector.load %arg13[%c0_37, %c0_38] : memref<32x128xf32, #tpu.memory_space<vmem>>, vector<32x128xf32>
    tpu.vector_store %arg13[%c0_37, %c0_38], %67 {strides = array<i32>} : memref<32x128xf32, #tpu.memory_space<vmem>>, vector<32x128xf32>,
    return
  }
  func.func @transform_0(%arg0: i32) -> (i32, i32) {
    %c0_i32 = arith.constant 0 : i32
    %c0_i32_0 = arith.constant 0 : i32
    %c0_i32_1 = arith.constant 0 : i32
    return %c0_i32, %c0_i32_0 : i32, i32
  }
  func.func @transform_1(%arg0: i32) -> (i32, i32) {
    %c0_i32 = arith.constant 0 : i32
    %c0_i32_0 = arith.constant 0 : i32
    %c0_i32_1 = arith.constant 0 : i32
    return %c0_i32, %c0_i32_0 : i32, i32
  }
  func.func @transform_2(%arg0: i32) -> (i32, i32) {
    %c0_i32 = arith.constant 0 : i32
    %c0_i32_0 = arith.constant 0 : i32
    %c0_i32_1 = arith.constant 0 : i32
    return %c0_i32, %c0_i32_0 : i32, i32
  }
  func.func @transform_3(%arg0: i32) -> (i32, i32) {
    %c0_i32 = arith.constant 0 : i32
    %c0_i32_0 = arith.constant 0 : i32
    %c0_i32_1 = arith.constant 0 : i32
    return %c0_i32, %c0_i32_0 : i32, i32
  }
  func.func @transform_4(%arg0: i32) -> (i32, i32) {
    %c0_i32 = arith.constant 0 : i32
    %c0_i32_0 = arith.constant 0 : i32
    %c0_i32_1 = arith.constant 0 : i32
    return %c0_i32, %c0_i32_0 : i32, i32
  }
  func.func @transform_5(%arg0: i32) -> (i32, i32) {
    %c0_i32 = arith.constant 0 : i32
    %c0_i32_0 = arith.constant 0 : i32
    %c0_i32_1 = arith.constant 0 : i32
    return %c0_i32, %c0_i32_0 : i32, i32
  }
  func.func @transform_6(%arg0: i32) -> (i32, i32) {
    %c0_i32 = arith.constant 0 : i32
    %c0_i32_0 = arith.constant 0 : i32
    %c0_i32_1 = arith.constant 0 : i32
    return %c0_i32, %c0_i32_0 : i32, i32
  }
  func.func @transform_7(%arg0: i32) -> (i32, i32) {
    %c0_i32 = arith.constant 0 : i32
    %c0_i32_0 = arith.constant 0 : i32
    %c0_i32_1 = arith.constant 0 : i32
    return %c0_i32, %c0_i32_0 : i32, i32
  }
  func.func @transform_8(%arg0: i32) -> (i32, i32) {
    %c0_i32 = arith.constant 0 : i32
    %c0_i32_0 = arith.constant 0 : i32
    %c0_i32_1 = arith.constant 0 : i32
    return %c0_i32, %c0_i32_0 : i32, i32
  }
  func.func @transform_9(%arg0: i32) -> (i32, i32) {
    %c0_i32 = arith.constant 0 : i32
    %c0_i32_0 = arith.constant 0 : i32
    %c0_i32_1 = arith.constant 0 : i32
    return %c0_i32, %c0_i32_0 : i32, i32
  }
  func.func @transform_10(%arg0: i32) -> (i32, i32) {
    %c0_i32 = arith.constant 0 : i32
    %c0_i32_0 = arith.constant 0 : i32
    %c0_i32_1 = arith.constant 0 : i32
    return %c0_i32, %c0_i32_0 : i32, i32
  }
  func.func @transform_11(%arg0: i32) -> (i32, i32) {
    %c0_i32 = arith.constant 0 : i32
    %c0_i32_0 = arith.constant 0 : i32
    %c0_i32_1 = arith.constant 0 : i32
    return %c0_i32, %c0_i32_0 : i32, i32
  }
  func.func @transform_12(%arg0: i32) -> (i32, i32) {
    %c0_i32 = arith.constant 0 : i32
    %c0_i32_0 = arith.constant 0 : i32
    %c0_i32_1 = arith.constant 0 : i32
    return %c0_i32, %c0_i32_0 : i32, i32
  }
}

</mosaic_0001>

<bundles_post_ra>
// kernel: gnn_forward.2
= control target key start
LH: loop header
LB: loop body
LE: loop exit
PB: predicated region body
PF: predicated region fallthrough
CT: control target
= control target key end

     0   :  { %v777_v0 = vmov 0.0   ;;  %vm778_vm0 = vmmov 0   ;;  %v779_v4 = vmov 0   ;;  %vm73_vm1 = vcmask 130048   ;;  %s967_s0 = inlined_call_operand.vmem [shape: f32[16,8], index: 0, kind: input, shape index: {}]   ;;  %s968_s3 = inlined_call_operand.vmem [shape: bf16[16,16], index: 3, kind: input, shape index: {}]   ;;  %s969_s4 = inlined_call_operand.vmem [shape: bf16[16,16], index: 4, kind: input, shape index: {}]   ;;  %s970_s5 = inlined_call_operand.vmem [shape: bf16[16,32], index: 5, kind: input, shape index: {}]   ;;  %s971_s2 = inlined_call_operand.vmem [shape: f32[16,1], index: 2, kind: input, shape index: {}]   ;;  %s972_s6 = inlined_call_operand.vmem [shape: bf16[16,32], index: 6, kind: input, shape index: {}]   ;;  %s973_s1 = inlined_call_operand.vmem [shape: f32[32,8], index: 1, kind: input, shape index: {}]   ;;  %s974_s7 = inlined_call_operand.vmem [shape: bf16[48,128], index: 7, kind: input, shape index: {}]   ;;  %s975_s8 = inlined_call_operand.vmem [shape: f32[1,128], index: 8, kind: input, shape index: {}]   ;;  %s976_s9 = inlined_call_operand.vmem [shape: f32[1,128], index: 9, kind: input, shape index: {}]   ;;  %s977_s10 = inlined_call_operand.vmem [shape: f32[1,128], index: 10, kind: input, shape index: {}]   ;;  %s978_s11 = inlined_call_operand.vmem [shape: f32[1,128], index: 11, kind: input, shape index: {}]   ;;  %s979_s12 = inlined_call_operand.vmem [shape: f32[16,128], index: 12, kind: output, shape index: {}]  }
   0x1   :  { %683 = vmatprep.subr.bf16.mxu1 %v777_v0  ;;  %v42_v1 = vld [vmem:[%s967_s0] sm:$0xff]  ;;  %v852_v2 = vld [vmem:[%s967_s0 + $0x8] sm:$0xff]  ;;  %685 = vmatprep.mubr.msk.bf16.mxu1 %vm778_vm0, %v777_v0  ;;  %v47_v12 = vld [vmem:[%s973_s1 + $0x10] sm:$0xff]  ;;  %vm287_vm2 = vcmask 1043456   ;;  %vm176_vm3 = vcmask 261120   ;;  %vm283_vm4 = vcmask 64512  }
   0x2   :  { %v44_v3 = vpack.c.bf16 %v852_v2, %v42_v1  ;;  %770 = vset.pattern.permute.xlu0 %v779_v4  ;;  %717 = vmatprep.subr.bf16.mxu0 %v777_v0  ;;  %v771_v5 = vld [vmem:[%s968_s3] sm:$0xff]   ;;  %v46_v8 = vld [vmem:[%s973_s1 + $0x8] sm:$0xff]  ;;  %v48_v13 = vld [vmem:[%s973_s1 + $0x18] sm:$0xff] }
   0x3   :  { %719 = vmatprep.mubr.msk.bf16.mxu0 %vm778_vm0, %v777_v0  ;;  %v51_v6 = vld [vmem:[%s971_s2] sm:$0xff]  ;;  %v52_v9 = vld [vmem:[%s971_s2 + $0x8] sm:$0xff]  ;;  %v50_v14 = vpack.c.bf16 %v48_v13, %v47_v12  ;;  %v280_v40 = vld [vmem:[%s974_s7 + $0x10] sm:$0xf] }
   0x4   :  { %684 = vmatpush3.bf16.msra.mxu1 %v44_v3  ;;  %v45_v7 = vld [vmem:[%s973_s1] sm:$0xff]  ;;  %55 = vperm.xlu0 %770, %v51_v6   ;;  %v278_v24 = vld [vmem:[%s974_s7 + $0x8] sm:$0xf]  ;;  %v279_v29 = vld [vmem:[%s974_s7 + $0xc] sm:$0xf]  ;;  %v491_v41 = vsel %vm287_vm2, %v280_v40, 0 }
   0x5   :  { %689 = vmatprep.subr.bf16.mxu1 %v777_v0  ;;  %v772_v10 = vld [vmem:[%s969_s4] sm:$0xff]   ;;  %v49_v11 = vpack.c.bf16 %v46_v8, %v45_v7  ;;  %v393_v27 = vsel %vm287_vm2, %v278_v24, 0  ;;  %v442_v34 = vsel %vm287_vm2, %v279_v29, 0  ;;  %v281_v47 = vld [vmem:[%s974_s7 + $0x14] sm:$0xf] }
   0x6   :  { %v277_v15 = vld [vmem:[%s974_s7 + $0x4] sm:$0xf]  ;;  %v276_v19 = vld [vmem:[%s974_s7] sm:$0xf]  ;;  %v540_v51 = vsel %vm287_vm2, %v281_v47, 0 }
   0x7   :  { %686 = vmatmul.mubr.msk.bf16.vlgmr.msra.gmra.mrb[0].mxu1 %vm73_vm1, %v771_v5  ;;  %v344_v16 = vsel %vm287_vm2, %v277_v15, 0  ;;  %v773_v17 = vld [vmem:[%s970_s5] sm:$0xff]   ;;  %v289_v20 = vsel %vm287_vm2, %v276_v19, 0 }
   0x8   :  { %690 = vmatpush3.bf16.msra.mxu1 %v44_v3  ;;  %691 = vmatprep.mubr.msk.bf16.mxu1 %vm778_vm0, %v777_v0  ;;  %v774_v18 = vld [vmem:[%s972_s6] sm:$0xff]  }
   0x9   :  { %695 = vmatprep.subr.bf16.mxu1 %v777_v0  ;;  %60 = vperm.xlu0 %770, %v52_v9   ;;  %v652_v58 = vld [vmem:[%s975_s8] ss:$0 sm:$0xff] }
   0xa   :  { %718 = vmatpush3.bf16.msra.mxu0 %v344_v16 }
   0xb   :  { %723 = vmatprep.subr.bf16.mxu0 %v777_v0 }
   0xf   :  { %692 = vmatmul.mubr.msk.bf16.vlgmr.msra.gmra.mrb[4].mxu1 %vm73_vm1, %v772_v10 }
  0x10   :  { %696 = vmatpush3.bf16.msra.mxu1 %v49_v11  ;;  %699 = vmatprep.mubr.msk.bf16.mxu1 %vm778_vm0, %v777_v0 }
  0x11   :  { %697 = vmatprep.subr.bf16.mxu1 %v777_v0 }
  0x14   :  { %698 = vmatpush3.bf16.msra.mxu1 %v50_v14 }
  0x15   :  { %703 = vmatprep.subr.bf16.mxu1 %v777_v0 }
  0x17   :  { %700 = vmatmul.mubr.msk.bf16.vlgmr.msra.gmra.mrb[8].mxu1 %vm176_vm3, %v773_v17 }
  0x18   :  { %704 = vmatpush3.bf16.msra.mxu1 %v49_v11  ;;  %707 = vmatprep.mubr.msk.bf16.mxu1 %vm778_vm0, %v777_v0 }
  0x19   :  { %705 = vmatprep.subr.bf16.mxu1 %v777_v0 }
  0x1c   :  { %706 = vmatpush3.bf16.msra.mxu1 %v50_v14 }
  0x1d   :  { %711 = vmatprep.subr.bf16.mxu1 %v777_v0 }
  0x1f   :  { %708 = vmatmul.mubr.msk.bf16.vlgmr.msra.gmra.mrb[12].mxu1 %vm176_vm3, %v774_v18 }
  0x20   :  { %713 = vmatprep.mubr.msk.bf16.mxu1 %vm778_vm0, %v777_v0  ;;  %712 = vmatpush3.bf16.msra.mxu1 %v289_v20 }
  0x27   :  { %714 = vmatmul.mubr.msk.bf16.vlgmr.msra.gmra.mrb[16].mxu1 %vm283_vm4, %v44_v3 }
  0x83   :  { %v56_v21 = vpop.permute.xlu0 %55 }
  0x84   :  { %v63_v22 = vmul.f32 %v56_v21, %v42_v1  ;;  %v658_v1 = vld [vmem:[%s976_s9] ss:$0 sm:$0xff] }
  0x88   :  { %v61_v23 = vpop.permute.xlu0 %60 }
  0x89   :  { %v64_v25 = vmul.f32 %v61_v23, %v852_v2 }
  0x8b   :  { %v65_v26 = vpack.c.bf16 %v64_v25, %v63_v22 }
  0x8d   :  { %720 = vmatmul.mubr.msk.bf16.vlgmr.msra.gmra.mrb[0].mxu0 %vm283_vm4, %v65_v26 }
  0x8e   :  { %724 = vmatpush3.bf16.msra.mxu0 %v393_v27  ;;  %725 = vmatprep.mubr.msk.bf16.mxu0 %vm778_vm0, %v777_v0 }
  0x8f   :  { %729 = vmatprep.subr.bf16.mxu0 %v777_v0 }
  0xda   :  { %v111_v28 = vpop.f32.mrb[0].mxu1 }
  0xdb   :  { %v687_v30 = vpop.f32.mrb[1].mxu1 }
  0xdc   :  { %v114_v31 = vpop.f32.mrb[2].mxu1 }
  0xdd   :  { %v272_v32 = vpack.c.bf16 %v114_v31, %v111_v28  ;;  %v688_v33 = vpop.f32.mrb[3].mxu1  ;;  %v659_v28 = vld [vmem:[%s977_s10] ss:$0 sm:$0xff] }
  0xde   :  { %v660_v31 = vld [vmem:[%s978_s11] ss:$0 sm:$0xff] }
  0xdf   :  { %726 = vmatmul.mubr.msk.bf16.vlgmr.msra.gmra.mrb[0].mxu0 %vm283_vm4, %v272_v32 }
  0xe0   :  { %730 = vmatpush3.bf16.msra.mxu0 %v442_v34  ;;  %731 = vmatprep.mubr.msk.bf16.mxu0 %vm778_vm0, %v777_v0 }
  0xe1   :  { %735 = vmatprep.subr.bf16.mxu0 %v777_v0 }
  0xe2   :  { %v162_v35 = vpop.f32.mrb[4].mxu1 }
  0xe3   :  { %v693_v36 = vpop.f32.mrb[5].mxu1 }
  0xe4   :  { %v165_v37 = vpop.f32.mrb[6].mxu1 }
  0xe5   :  { %v273_v38 = vpack.c.bf16 %v165_v37, %v162_v35  ;;  %v694_v39 = vpop.f32.mrb[7].mxu1 }
  0xea   :  { %v214_v42 = vpop.f32.mrb[8].mxu1 }
  0xeb   :  { %732 = vmatmul.mubr.msk.bf16.vlgmr.msra.gmra.mrb[0].mxu0 %vm283_vm4, %v273_v38  ;;  %v701_v43 = vpop.f32.mrb[9].mxu1 }
  0xec   :  { %736 = vmatpush3.bf16.msra.mxu0 %v491_v41  ;;  %v217_v44 = vpop.f32.mrb[10].mxu1  ;;  %737 = vmatprep.mubr.msk.bf16.mxu0 %vm778_vm0, %v777_v0 }
  0xed   :  { %v274_v45 = vpack.c.bf16 %v217_v44, %v214_v42  ;;  %v702_v46 = vpop.f32.mrb[11].mxu1  ;;  %741 = vmatprep.subr.bf16.mxu0 %v777_v0 }
  0xf2   :  { %v265_v48 = vpop.f32.mrb[12].mxu1 }
  0xf3   :  { %v709_v49 = vpop.f32.mrb[13].mxu1 }
  0xf4   :  { %v268_v50 = vpop.f32.mrb[14].mxu1 }
  0xf5   :  { %v275_v52 = vpack.c.bf16 %v268_v50, %v265_v48  ;;  %v710_v53 = vpop.f32.mrb[15].mxu1 }
  0xf7   :  { %738 = vmatmul.mubr.msk.bf16.vlgmr.msra.gmra.mrb[0].mxu0 %vm283_vm4, %v274_v45 }
  0xf8   :  { %742 = vmatpush3.bf16.msra.mxu0 %v540_v51  ;;  %743 = vmatprep.mubr.msk.bf16.mxu0 %vm778_vm0, %v777_v0 }
  0xfa   :  { %v325_v54 = vpop.f32.mrb[16].mxu1 }
  0xfb   :  { %v715_v55 = vpop.f32.mrb[17].mxu1  ;;  %v338_v59 = vadd.f32 %v652_v58, %v325_v54 }
  0xfc   :  { %v328_v56 = vpop.f32.mrb[18].mxu1 }
  0xfd   :  { %v716_v57 = vpop.f32.mrb[19].mxu1  ;;  %v339_v61 = vadd.f32 %v652_v58, %v328_v56 }
 0x103   :  { %744 = vmatmul.mubr.msk.bf16.vlgmr.msra.gmra.mrb[0].mxu0 %vm283_vm4, %v275_v52 }
 0x1d6   :  { %v576_v60 = vpop.f32.mrb[0].mxu0 }
 0x1d7   :  { %v748_v62 = vadd.f32 %v576_v60, %v338_v59  ;;  %v745_v63 = vpop.f32.mrb[1].mxu0 }
 0x1d8   :  { %v579_v0 = vpop.f32.mrb[2].mxu0 }
 0x1d9   :  { %v750_v2 = vadd.f32 %v579_v0, %v339_v61  ;;  %v746_v3 = vpop.f32.mrb[3].mxu0  ;;  %v592_v4 = vmax.f32 %v748_v62, %v658_v1 }
 0x1db   :  { %v593_v5 = vmax.f32 %v750_v2, %v658_v1 }
 0x1dd   :  { %v594_v6 = vadd.f32 %v593_v5, %v592_v4 }
 0x1df   :  { %v595_v7 = vrot.slane %v594_v6, 4 }
 0x1e1   :  { %v596_v8 = vadd.f32 %v595_v7, %v594_v6 }
 0x1e3   :  { %v597_v9 = vrot.slane %v596_v8, 2 }
 0x1e5   :  { %v598_v10 = vadd.f32 %v597_v9, %v596_v8 }
 0x1e7   :  { %v599_v11 = vrot.slane %v598_v10, 1 }
 0x1e9   :  { %v600_v12 = vadd.f32 %v599_v11, %v598_v10 }
 0x1eb   :  { %v602_v13 = vmul.f32 0.0625, %v600_v12 }
 0x1ed   :  { %v603_v14 = vsub.f32 %v592_v4, %v602_v13  ;;  %v604_v15 = vsub.f32 %v593_v5, %v602_v13 }
 0x1ef   :  { %v605_v16 = vmul.f32 %v603_v14, %v603_v14  ;;  %v606_v17 = vmul.f32 %v604_v15, %v604_v15 }
 0x1f1   :  { %v607_v18 = vadd.f32 %v606_v17, %v605_v16 }
 0x1f3   :  { %v608_v19 = vrot.slane %v607_v18, 4 }
 0x1f5   :  { %v609_v20 = vadd.f32 %v608_v19, %v607_v18 }
 0x1f7   :  { %v610_v21 = vrot.slane %v609_v20, 2 }
 0x1f9   :  { %v611_v22 = vadd.f32 %v610_v21, %v609_v20 }
 0x1fb   :  { %v612_v23 = vrot.slane %v611_v22, 1 }
 0x1fd   :  { %v613_v24 = vadd.f32 %v612_v23, %v611_v22 }
 0x1ff   :  { %v614_v25 = vmul.f32 0.0625, %v613_v24 }
 0x201   :  { %v615_v26 = vadd.f32 1e-05, %v614_v25 }
 0x203   :  { %775 = vrsqrt.f32 %v615_v26 }
 0x20d   :  { %v776_v27 = vpop.eup %775 }
 0x20e   :  { %v617_v29 = vmul.f32 %v776_v27, %v603_v14  ;;  %v618_v30 = vmul.f32 %v776_v27, %v604_v15 }
 0x210   :  { %v626_v32 = vmul.f32 %v659_v28, %v617_v29  ;;  %v627_v33 = vmul.f32 %v659_v28, %v618_v30 }
 0x212   :  { %v635_v34 = vadd.f32 %v660_v31, %v626_v32  ;;  %v636_v35 = vadd.f32 %v660_v31, %v627_v33 }
 0x214   :  { %637 = vst [vmem:[%s979_s12] sm:$0xff] %v635_v34  ;;  %638 = vst [vmem:[%s979_s12 + $0x8] sm:$0xff] %v636_v35 }

// kernel: gnn_forward.3
= control target key start
LH: loop header
LB: loop body
LE: loop exit
PB: predicated region body
PF: predicated region fallthrough
CT: control target
= control target key end

     0   :  { %v1193_v1 = vmov 0   ;;  %vm95_vm0 = vcmask 261120   ;;  %vm431_vm1 = vcmask 1043456   ;;  %vm424_vm2 = vcmask 64512   ;;  %s1427_s5 = inlined_call_operand.vmem [shape: bf16[16,32], index: 5, kind: input, shape index: {}]   ;;  %s1428_s6 = inlined_call_operand.vmem [shape: bf16[16,32], index: 6, kind: input, shape index: {}]   ;;  %s1429_s0 = inlined_call_operand.vmem [shape: f32[32,8], index: 0, kind: input, shape index: {}]   ;;  %s1430_s3 = inlined_call_operand.vmem [shape: bf16[32,32], index: 3, kind: input, shape index: {}]   ;;  %s1431_s4 = inlined_call_operand.vmem [shape: bf16[32,32], index: 4, kind: input, shape index: {}]   ;;  %s1432_s2 = inlined_call_operand.vmem [shape: f32[32,1], index: 2, kind: input, shape index: {}]   ;;  %s1433_s7 = inlined_call_operand.vmem [shape: bf16[288,128], index: 7, kind: input, shape index: {}]   ;;  %s1434_s1 = inlined_call_operand.vmem [shape: f32[16,128], index: 1, kind: input, shape index: {}]   ;;  %s1435_s8 = inlined_call_operand.vmem [shape: f32[1,128], index: 8, kind: input, shape index: {}]   ;;  %s1436_s9 = inlined_call_operand.vmem [shape: f32[1,128], index: 9, kind: input, shape index: {}]   ;;  %s1437_s10 = inlined_call_operand.vmem [shape: f32[1,128], index: 10, kind: input, shape index: {}]   ;;  %s1438_s11 = inlined_call_operand.vmem [shape: f32[1,128], index: 11, kind: input, shape index: {}]   ;;  %s1439_s12 = inlined_call_operand.vmem [shape: f32[32,128], index: 12, kind: output, shape index: {}]  }
   0x1   :  { %v1169_v0 = vld [vmem:[%s1427_s5] sm:$0xff]   ;;  %1167 = vset.pattern.permute.xlu1 %v1193_v1  ;;  %v1273_v4 = vld [vmem:[%s1429_s0 + $0x8] sm:$0xff]  ;;  %v1278_v5 = vld [vmem:[%s1429_s0 + $0x10] sm:$0xff]  ;;  %vm244_vm3 = vcmask 130048  }
   0x2   :  { %v1170_v2 = vld [vmem:[%s1428_s6] sm:$0xff]   ;;  %228 = vxpose.xlu0.c.b16.start.end [1/1] (short) (narrow) %v1169_v0, 32  ;;  %v1285_v7 = vld [vmem:[%s1429_s0 + $0x18] sm:$0xff]  ;;  %v1172_v10 = vld [vmem:[%s1430_s3 + $0x8] sm:$0xff]  }
   0x3   :  { %v1268_v3 = vld [vmem:[%s1429_s0] sm:$0xff]  ;;  %v47_v8 = vpack.c.bf16 %v1285_v7, %v1278_v5  ;;  %v49_v15 = vld [vmem:[%s1434_s1 + $0x8] sm:$0xff]  ;;  %v53_v18 = vld [vmem:[%s1432_s2 + $0x10] sm:$0xff] }
   0x4   :  { %v46_v6 = vpack.c.bf16 %v1273_v4, %v1268_v3  ;;  %v1171_v9 = vld [vmem:[%s1430_s3] sm:$0xff]   ;;  %v52_v16 = vld [vmem:[%s1432_s2 + $0x8] sm:$0xff]  ;;  %v54_v21 = vld [vmem:[%s1432_s2 + $0x18] sm:$0xff] }
   0x5   :  { %1050 = vmatprep.mubr.msk.bf16.mxu1 %vm95_vm0, %v1171_v9  ;;  %v51_v11 = vld [vmem:[%s1432_s2] sm:$0xff]  ;;  %v1174_v19 = vld [vmem:[%s1431_s4 + $0x8] sm:$0xff]   ;;  %v1175_v28 = vld [vmem:[%s1433_s7 + $0x10] sm:$0xff]  }
   0x6   :  { %1046 = vmatprep.subr.bf16.mxu1 %v46_v6  ;;  %v1173_v12 = vld [vmem:[%s1431_s4] sm:$0xff]   ;;  %57 = vperm.xlu1 %1167, %v51_v11   ;;  %v389_v24 = vld [vmem:[%s1433_s7 + $0x8] sm:$0xf]  ;;  %v1176_v29 = vld [vmem:[%s1433_s7 + $0x18] sm:$0xff]  }
   0x7   :  { %1047 = vmatpush3.bf16.msra.mxu1 %v46_v6  ;;  %308 = vxpose.xlu0.c.b16.start.end [1/1] (short) (narrow) %v1170_v2, 32  ;;  %v387_v13 = vld [vmem:[%s1433_s7] sm:$0xf]  ;;  %v388_v22 = vld [vmem:[%s1433_s7 + $0x4] sm:$0xf]  ;;  %v1179_v32 = vld [vmem:[%s1433_s7 + $0x28] sm:$0xff]  }
   0x8   :  { %1048 = vmatprep.subr.bf16.mxu1 %v47_v8  ;;  %v48_v14 = vld [vmem:[%s1434_s1] sm:$0xff]  ;;  %1162 = vmatprep.subr.msk.bf16.mxu0 %vm431_vm1, %v387_v13  ;;  %v433_v17 = vsel %vm431_vm1, %v387_v13, 0  ;;  %v501_v23 = vsel %vm431_vm1, %v388_v22, 0  ;;  %v1181_v33 = vld [vmem:[%s1433_s7 + $0x30] sm:$0xff]   ;;  %v1183_v34 = vld [vmem:[%s1433_s7 + $0x38] sm:$0xff]   ;;  %v563_v46 = vsel %vm431_vm1, %v389_v24, 0 }
   0x9   :  { %1075 = vmatpush3.bf16.msra.mxu0 %v433_v17  ;;  %1076 = vmatprep.mubr.msk.bf16.mxu0 %vm424_vm2, %v46_v6  ;;  %v50_v20 = vpack.c.bf16 %v49_v15, %v48_v14  ;;  %v1177_v31 = vld [vmem:[%s1433_s7 + $0x20] sm:$0xff]   ;;  %v390_v47 = vld [vmem:[%s1433_s7 + $0xc] sm:$0xf]  ;;  %v1178_v56 = vld [vmem:[%s1433_s7 + $0x50] sm:$0xff]  }
   0xa   :  { %62 = vperm.xlu1 %1167, %v52_v16   ;;  %1163 = vmatprep.subr.msk.bf16.mxu0 %vm431_vm1, %v388_v22  ;;  %v1185_v35 = vld [vmem:[%s1433_s7 + $0x40] sm:$0xff]   ;;  %v1187_v48 = vld [vmem:[%s1433_s7 + $0x48] sm:$0xff]   ;;  %v625_v55 = vsel %vm431_vm1, %v390_v47, 0  ;;  %v1180_v63 = vld [vmem:[%s1433_s7 + $0x58] sm:$0xff]  }
   0xb   :  { %1049 = vmatpush3.bf16.msra.mxu1 %v47_v8  ;;  %v1182_v0 = vld [vmem:[%s1433_s7 + $0x60] sm:$0xff]   ;;  %v1186_v2 = vld [vmem:[%s1433_s7 + $0x70] sm:$0xff]  }
   0xc   :  { %1054 = vmatprep.subr.bf16.mxu1 %v46_v6  ;;  %1077 = vmatmul.mubr.msk.bf16.vlgmr.msra.gmra.mrb[0].mxu0 %vm424_vm2, %v47_v8  ;;  %v974_v22 = vld [vmem:[%s1435_s8] ss:$0 sm:$0xff] }
   0xd   :  { %1081 = vmatpush3.bf16.msra.mxu0 %v501_v23 }
   0xe   :  { %1051 = vmatmul.mubr.msk.bf16.vlgmr.msra.gmra.mrb[0].mxu1 %vm95_vm0, %v1172_v10  ;;  %67 = vperm.xlu1 %1167, %v53_v18  }
   0xf   :  { %1055 = vmatpush3.bf16.msra.mxu1 %v46_v6  ;;  %1058 = vmatprep.mubr.msk.bf16.mxu1 %vm95_vm0, %v1173_v12 }
  0x10   :  { %1056 = vmatprep.subr.bf16.mxu1 %v47_v8  ;;  %1168 = vset.pattern.permute.xlu0 %v1193_v1  ;;  %v1184_v1 = vld [vmem:[%s1433_s7 + $0x68] sm:$0xff]  }
  0x11   :  { %1164 = vmatprep.subr.msk.bf16.mxu0 %vm431_vm1, %v389_v24 }
  0x13   :  { %1057 = vmatpush3.bf16.msra.mxu1 %v47_v8 }
  0x14   :  { %1062 = vmatprep.subr.bf16.mxu1 %v50_v20  ;;  %72 = vperm.xlu0 %1168, %v54_v21  }
  0x16   :  { %1059 = vmatmul.mubr.msk.bf16.vlgmr.msra.gmra.mrb[4].mxu1 %vm95_vm0, %v1174_v19 }
  0x17   :  { %1063 = vmatpush3.bf16.msra.mxu1 %v50_v20 }
  0x18   :  { %1068 = vmatprep.subr.bf16.mxu1 %v50_v20 }
  0x68   :  { %v236_v25 = vpop.trf.xlu0 }
  0x69   :  { %1064 = vmatprep.mubr.msk.bf16.mxu1 %vm244_vm3, %v236_v25 }
  0x6c   :  { %v237_v26 = vpop.trf.xlu0 }
  0x6d   :  { %1065 = vmatmul.mubr.msk.bf16.vlgmr.msra.gmra.mrb[8].mxu1 %vm244_vm3, %v237_v26 }
  0x6e   :  { %1069 = vmatpush3.bf16.msra.mxu1 %v50_v20 }
  0x6f   :  { %1098 = vmatprep.subr.bf16.mxu1 %v1175_v28 }
  0x70   :  { %v316_v27 = vpop.trf.xlu0 }
  0x71   :  { %1070 = vmatprep.mubr.msk.bf16.mxu1 %vm244_vm3, %v316_v27 }
  0x74   :  { %v317_v30 = vpop.trf.xlu0 }
  0x75   :  { %1071 = vmatmul.mubr.msk.bf16.vlgmr.msra.gmra.mrb[12].mxu1 %vm244_vm3, %v317_v30 }
  0x76   :  { %1099 = vmatpush3.bf16.msra.mxu1 %v1175_v28 }
  0x77   :  { %1100 = vmatprep.subr.bf16.mxu1 %v1176_v29 }
  0x7a   :  { %1101 = vmatpush3.bf16.msra.mxu1 %v1176_v29 }
  0x7b   :  { %1102 = vmatprep.subr.bf16.mxu1 %v1177_v31 }
  0x7e   :  { %1103 = vmatpush3.bf16.msra.mxu1 %v1177_v31 }
  0x7f   :  { %1104 = vmatprep.subr.bf16.mxu1 %v1179_v32 }
  0x82   :  { %1105 = vmatpush3.bf16.msra.mxu1 %v1179_v32 }
  0x83   :  { %1106 = vmatprep.subr.bf16.mxu1 %v1181_v33 }
  0x85   :  { %v58_v36 = vpop.permute.xlu1 %57 }
  0x86   :  { %1107 = vmatpush3.bf16.msra.mxu1 %v1181_v33  ;;  %v75_v37 = vmul.f32 %v58_v36, %v1268_v3  ;;  %v1188_v3 = vld [vmem:[%s1433_s7 + $0x78] sm:$0xff]  }
  0x87   :  { %1108 = vmatprep.subr.bf16.mxu1 %v1183_v34 }
  0x89   :  { %v63_v38 = vpop.permute.xlu1 %62 }
  0x8a   :  { %1109 = vmatpush3.bf16.msra.mxu1 %v1183_v34  ;;  %v76_v39 = vmul.f32 %v63_v38, %v1273_v4  ;;  %v1189_v4 = vld [vmem:[%s1433_s7 + $0x80] sm:$0xff]  }
  0x8b   :  { %1110 = vmatprep.subr.bf16.mxu1 %v1185_v35 }
  0x8c   :  { %v79_v40 = vpack.c.bf16 %v76_v39, %v75_v37 }
  0x8d   :  { %v68_v41 = vpop.permute.xlu1 %67 }
  0x8e   :  { %1111 = vmatpush3.bf16.msra.mxu1 %v1185_v35  ;;  %1082 = vmatprep.mubr.msk.bf16.mxu0 %vm424_vm2, %v79_v40  ;;  %v77_v42 = vmul.f32 %v68_v41, %v1278_v5  ;;  %v1190_v5 = vld [vmem:[%s1433_s7 + $0x88] sm:$0xff]   ;;  %v997_v40 = vld [vmem:[%s1436_s9] ss:$0 sm:$0xff] }
  0x8f   :  { %1112 = vmatprep.subr.bf16.mxu1 %v1187_v48 }
  0x92   :  { %1113 = vmatpush3.bf16.msra.mxu1 %v1187_v48 }
  0x93   :  { %v73_v43 = vpop.permute.xlu0 %72 }
  0x94   :  { %v78_v44 = vmul.f32 %v73_v43, %v1285_v7 }
  0x96   :  { %v80_v45 = vpack.c.bf16 %v78_v44, %v77_v42 }
  0x98   :  { %1083 = vmatmul.mubr.msk.bf16.vlgmr.msra.gmra.mrb[0].mxu0 %vm424_vm2, %v80_v45 }
  0x99   :  { %1087 = vmatpush3.bf16.msra.mxu0 %v563_v46 }
  0x9a   :  { %1165 = vmatprep.subr.msk.bf16.mxu0 %vm431_vm1, %v390_v47 }
  0xe1   :  { %v1052_v49 = vpop.f32.mrb[0].mxu1 }
  0xe2   :  { %v136_v50 = vpop.f32.mrb[1].mxu1 }
  0xe3   :  { %v1053_v51 = vpop.f32.mrb[2].mxu1 }
  0xe4   :  { %v380_v52 = vpack.c.bf16 %v1053_v51, %v1052_v49  ;;  %v139_v53 = vpop.f32.mrb[3].mxu1 }
  0xe5   :  { %v379_v54 = vpack.c.bf16 %v139_v53, %v136_v50 }
  0xe7   :  { %1088 = vmatprep.mubr.msk.bf16.mxu0 %vm424_vm2, %v379_v54 }
  0xe8   :  { %1089 = vmatmul.mubr.msk.bf16.vlgmr.msra.gmra.mrb[0].mxu0 %vm424_vm2, %v380_v52 }
  0xe9   :  { %v1060_v57 = vpop.f32.mrb[4].mxu1  ;;  %1093 = vmatpush3.bf16.msra.mxu0 %v625_v55 }
  0xea   :  { %v205_v58 = vpop.f32.mrb[5].mxu1  ;;  %1118 = vmatprep.subr.bf16.mxu0 %v1178_v56 }
  0xeb   :  { %v1061_v59 = vpop.f32.mrb[6].mxu1 }
  0xec   :  { %v382_v60 = vpack.c.bf16 %v1061_v59, %v1060_v57  ;;  %v208_v61 = vpop.f32.mrb[7].mxu1 }
  0xed   :  { %v381_v62 = vpack.c.bf16 %v208_v61, %v205_v58 }
  0xef   :  { %1094 = vmatprep.mubr.msk.bf16.mxu0 %vm424_vm2, %v381_v62 }
  0xf4   :  { %1095 = vmatmul.mubr.msk.bf16.vlgmr.msra.gmra.mrb[0].mxu0 %vm424_vm2, %v382_v60 }
  0xf5   :  { %1119 = vmatpush3.bf16.msra.mxu0 %v1178_v56 }
  0xf6   :  { %1120 = vmatprep.subr.bf16.mxu0 %v1180_v63 }
  0xf9   :  { %1121 = vmatpush3.bf16.msra.mxu0 %v1180_v63 }
  0xfa   :  { %1122 = vmatprep.subr.bf16.mxu0 %v1182_v0 }
  0xfd   :  { %1123 = vmatpush3.bf16.msra.mxu0 %v1182_v0 }
  0xfe   :  { %1124 = vmatprep.subr.bf16.mxu0 %v1184_v1 }
 0x101   :  { %1125 = vmatpush3.bf16.msra.mxu0 %v1184_v1 }
 0x102   :  { %1126 = vmatprep.subr.bf16.mxu0 %v1186_v2 }
 0x105   :  { %1127 = vmatpush3.bf16.msra.mxu0 %v1186_v2 }
 0x106   :  { %1128 = vmatprep.subr.bf16.mxu0 %v1188_v3 }
 0x109   :  { %1129 = vmatpush3.bf16.msra.mxu0 %v1188_v3 }
 0x10a   :  { %1130 = vmatprep.subr.bf16.mxu0 %v1189_v4 }
 0x10d   :  { %1131 = vmatpush3.bf16.msra.mxu0 %v1189_v4 }
 0x10e   :  { %1132 = vmatprep.subr.bf16.mxu0 %v1190_v5 }
 0x111   :  { %1133 = vmatpush3.bf16.msra.mxu0 %v1190_v5 }
 0x140   :  { %v1066_v6 = vpop.f32.mrb[8].mxu1 }
 0x141   :  { %v285_v7 = vpop.f32.mrb[9].mxu1 }
 0x142   :  { %v1067_v8 = vpop.f32.mrb[10].mxu1 }
 0x143   :  { %v384_v9 = vpack.c.bf16 %v1067_v8, %v1066_v6  ;;  %v288_v10 = vpop.f32.mrb[11].mxu1 }
 0x144   :  { %v383_v11 = vpack.c.bf16 %v288_v10, %v285_v7 }
 0x146   :  { %1114 = vmatprep.mubr.bf16.mxu1 %v383_v11 }
 0x147   :  { %1115 = vmatmul.mubr.bf16.vlgmr.msra.gmra.mrb[16].mxu1 %v384_v9 }
 0x148   :  { %v1072_v12 = vpop.f32.mrb[12].mxu1 }
 0x149   :  { %v364_v13 = vpop.f32.mrb[13].mxu1 }
 0x14a   :  { %v1073_v14 = vpop.f32.mrb[14].mxu1 }
 0x14b   :  { %v386_v15 = vpack.c.bf16 %v1073_v14, %v1072_v12  ;;  %v367_v16 = vpop.f32.mrb[15].mxu1  ;;  %v998_v14 = vld [vmem:[%s1437_s10] ss:$0 sm:$0xff] }
 0x14c   :  { %v385_v17 = vpack.c.bf16 %v367_v16, %v364_v13 }
 0x14e   :  { %1134 = vmatprep.mubr.bf16.mxu0 %v385_v17 }
 0x14f   :  { %1135 = vmatmul.mubr.bf16.vlgmr.msra.gmra.mrb[4].mxu0 %v386_v15 }
 0x1c7   :  { %v1096_v18 = vpop.f32.mrb[0].mxu0 }
 0x1c8   :  { %v661_v19 = vpop.f32.mrb[1].mxu0  ;;  %v1138_v23 = vadd.f32 %v1096_v18, %v974_v22 }
 0x1c9   :  { %v1097_v20 = vpop.f32.mrb[2].mxu0  ;;  %v1141_v24 = vadd.f32 %v974_v22, %v661_v19  ;;  %v999_v19 = vld [vmem:[%s1438_s11] ss:$0 sm:$0xff] }
 0x1ca   :  { %v664_v21 = vpop.f32.mrb[3].mxu0  ;;  %v1144_v26 = vadd.f32 %v1097_v20, %v974_v22 }
 0x1cb   :  { %v1147_v29 = vadd.f32 %v974_v22, %v664_v21 }
 0x21a   :  { %v1116_v25 = vpop.f32.mrb[16].mxu1 }
 0x21b   :  { %v1139_v27 = vadd.f32 %v1138_v23, %v1116_v25  ;;  %v762_v28 = vpop.f32.mrb[17].mxu1 }
 0x21c   :  { %v1142_v30 = vadd.f32 %v1141_v24, %v762_v28  ;;  %v1117_v31 = vpop.f32.mrb[18].mxu1 }
 0x21d   :  { %v1145_v32 = vadd.f32 %v1144_v26, %v1117_v31  ;;  %v765_v33 = vpop.f32.mrb[19].mxu1 }
 0x21e   :  { %v1148_v34 = vadd.f32 %v1147_v29, %v765_v33 }
 0x222   :  { %v1136_v35 = vpop.f32.mrb[4].mxu0 }
 0x223   :  { %v1140_v36 = vadd.f32 %v1139_v27, %v1136_v35  ;;  %v863_v37 = vpop.f32.mrb[5].mxu0 }
 0x224   :  { %v1143_v38 = vadd.f32 %v1142_v30, %v863_v37  ;;  %v1137_v39 = vpop.f32.mrb[6].mxu0 }
 0x225   :  { %v1146_v41 = vadd.f32 %v1145_v32, %v1137_v39  ;;  %v866_v42 = vpop.f32.mrb[7].mxu0  ;;  %v891_v46 = vmax.f32 %v1140_v36, %v997_v40 }
 0x226   :  { %v1149_v43 = vadd.f32 %v1148_v34, %v866_v42  ;;  %v889_v44 = vmax.f32 %v1143_v38, %v997_v40 }
 0x227   :  { %v892_v48 = vmax.f32 %v1146_v41, %v997_v40 }
 0x228   :  { %v890_v45 = vmax.f32 %v1149_v43, %v997_v40 }
 0x22a   :  { %v893_v47 = vadd.f32 %v890_v45, %v889_v44 }
 0x22c   :  { %v894_v49 = vadd.f32 %v893_v47, %v891_v46 }
 0x22e   :  { %v895_v50 = vadd.f32 %v894_v49, %v892_v48 }
 0x230   :  { %v896_v51 = vrot.slane %v895_v50, 4 }
 0x232   :  { %v897_v52 = vadd.f32 %v896_v51, %v895_v50 }
 0x234   :  { %v898_v53 = vrot.slane %v897_v52, 2 }
 0x236   :  { %v899_v54 = vadd.f32 %v898_v53, %v897_v52 }
 0x238   :  { %v900_v55 = vrot.slane %v899_v54, 1 }
 0x23a   :  { %v901_v56 = vadd.f32 %v900_v55, %v899_v54 }
 0x23c   :  { %v903_v57 = vmul.f32 0.03125, %v901_v56 }
 0x23e   :  { %v904_v58 = vsub.f32 %v889_v44, %v903_v57  ;;  %v905_v59 = vsub.f32 %v890_v45, %v903_v57  ;;  %v906_v60 = vsub.f32 %v891_v46, %v903_v57  ;;  %v907_v61 = vsub.f32 %v892_v48, %v903_v57 }
 0x240   :  { %v908_v62 = vmul.f32 %v904_v58, %v904_v58  ;;  %v909_v63 = vmul.f32 %v905_v59, %v905_v59  ;;  %v910_v0 = vmul.f32 %v906_v60, %v906_v60  ;;  %v911_v2 = vmul.f32 %v907_v61, %v907_v61 }
 0x242   :  { %v912_v1 = vadd.f32 %v909_v63, %v908_v62 }
 0x244   :  { %v913_v3 = vadd.f32 %v912_v1, %v910_v0 }
 0x246   :  { %v914_v4 = vadd.f32 %v913_v3, %v911_v2 }
 0x248   :  { %v915_v5 = vrot.slane %v914_v4, 4 }
 0x24a   :  { %v916_v6 = vadd.f32 %v915_v5, %v914_v4 }
 0x24c   :  { %v917_v7 = vrot.slane %v916_v6, 2 }
 0x24e   :  { %v918_v8 = vadd.f32 %v917_v7, %v916_v6 }
 0x250   :  { %v919_v9 = vrot.slane %v918_v8, 1 }
 0x252   :  { %v920_v10 = vadd.f32 %v919_v9, %v918_v8 }
 0x254   :  { %v921_v11 = vmul.f32 0.03125, %v920_v10 }
 0x256   :  { %v922_v12 = vadd.f32 1e-05, %v921_v11 }
 0x258   :  { %1191 = vrsqrt.f32 %v922_v12 }
 0x262   :  { %v1192_v13 = vpop.eup %1191 }
 0x263   :  { %v924_v15 = vmul.f32 %v1192_v13, %v904_v58  ;;  %v925_v16 = vmul.f32 %v1192_v13, %v905_v59  ;;  %v926_v17 = vmul.f32 %v1192_v13, %v906_v60  ;;  %v927_v18 = vmul.f32 %v1192_v13, %v907_v61 }
 0x265   :  { %v935_v20 = vmul.f32 %v998_v14, %v924_v15  ;;  %v936_v21 = vmul.f32 %v998_v14, %v925_v16  ;;  %v937_v22 = vmul.f32 %v998_v14, %v926_v17  ;;  %v938_v23 = vmul.f32 %v998_v14, %v927_v18 }
 0x267   :  { %v946_v24 = vadd.f32 %v999_v19, %v935_v20  ;;  %v947_v25 = vadd.f32 %v999_v19, %v936_v21  ;;  %v948_v26 = vadd.f32 %v999_v19, %v937_v22  ;;  %v949_v27 = vadd.f32 %v999_v19, %v938_v23 }
 0x269   :  { %950 = vst [vmem:[%s1439_s12] sm:$0xff] %v946_v24  ;;  %951 = vst [vmem:[%s1439_s12 + $0x8] sm:$0xff] %v947_v25 }
 0x26a   :  { %952 = vst [vmem:[%s1439_s12 + $0x10] sm:$0xff] %v948_v26  ;;  %953 = vst [vmem:[%s1439_s12 + $0x18] sm:$0xff] %v949_v27 }

</bundles_post_ra>
